<compile_context>
chip_gen: v7x
topology: tpu7x:2x2x1
jax: 0.10.0
libtpu: 0.0.40
codegen_flags: <defaults>
</compile_context>

<pallas_src>
import jax
import jax.numpy as jnp
from jax import lax
from jax.experimental import pallas as pl
from jax.experimental.pallas import tpu as pltpu


_LANES = 128       # lane width (last-dim tile)
_CHUNK = 512       # in-kernel lane chunk: bounds live vregs per layer step
_MAX_BM = 8192     # max lanes per grid step (amortizes per-step pipeline cost)
_FMA_MAX_K = 8     # contraction depth below which the MXU is pointless
_NUM_CORES = 2     # v7x TensorCores; even grid is harmless on v5e/v6e


def _layer_mode(d_out, d_in):
    if d_in <= _FMA_MAX_K:
        return "fma"      # e.g. PINN input layer (K=2): pure VPU FMAs
    if d_out == 1:
        return "reduce"   # single output row: VPU mul + sublane reduce
    return "mxu"


def make_mlp_kernel(modes, *, chunk, num_chunks, compute_dtype, precision):
    """refs = (xT_ref, w0, b0, w1, b1, ..., outT_ref); xT block is (d_in, bm)."""
    num_layers = len(modes)

    def apply_layer(h, w, b, mode):
        # h: (d_in, chunk). b: (d_out, 1) f32 (lane-broadcast).
        if mode == "fma":
            # Tiny K: MXU would run at ~1% utilization and still pay the
            # vmatmul push / result pop; VPU slots have plenty of slack.
            hf = h.astype(jnp.float32)
            acc = b
            for k in range(w.shape[1]):
                acc = acc + w[:, k:k + 1] * hf[k:k + 1, :]
            return acc
        if mode == "reduce":
            # d_out == 1: w arrives pre-transposed as (d_in, 1) f32.
            hf = h.astype(jnp.float32)
            return jnp.sum(w * hf, axis=0, keepdims=True) + b
        # MXU path: w pre-cast to compute_dtype in the wrapper, f32 accumulate.
        return jnp.dot(w, h.astype(compute_dtype),
                       preferred_element_type=jnp.float32,
                       precision=precision) + b

    def kernel(*refs):
        x_ref = refs[0]
        out_ref = refs[-1]
        params = refs[1:-1]

        # Params are tiny: load once per grid step, reuse across chunks.
        w_vals = [params[2 * i][...] for i in range(num_layers)]
        b_vals = [params[2 * i + 1][...] for i in range(num_layers)]

        def chunk_body(c, carry):
            off = pl.multiple_of(c * chunk, chunk)
            h = x_ref[:, pl.ds(off, chunk)]
            for i in range(num_layers):
                acc = apply_layer(h, w_vals[i], b_vals[i], modes[i])
                if i < num_layers - 1:
                    # tanh on the EUP; bf16 doubles EUP throughput on v6e/v7x.
                    h = jnp.tanh(acc.astype(compute_dtype))
                else:
                    h = acc
            out_ref[:, pl.ds(off, chunk)] = h.astype(out_ref.dtype)
            return carry

        # fori_loop (not a Python for) bounds live ranges so vreg pressure and
        # spill traffic stay flat as the lane tile grows.
        lax.fori_loop(0, num_chunks, chunk_body, 0)

    return kernel


def _choose_bm(n):
    """Lane tile: multiple of 128 (and of _CHUNK when above it).  Prefers an
    EVEN grid once there is enough work so v7x's 2 TCs split it evenly."""
    if n <= _CHUNK:
        return _LANES * pl.cdiv(n, _LANES)
    chunks = pl.cdiv(n, _CHUNK)
    max_cpb = _MAX_BM // _CHUNK
    if chunks < 4:
        return _CHUNK * min(chunks, max_cpb)   # single big block
    best = min(chunks, max_cpb)
    for cpb in range(min(chunks, max_cpb), 0, -1):
        if pl.cdiv(chunks, cpb) % _NUM_CORES == 0:
            best = cpb
            break
    return _CHUNK * best


def dnn_forward(x, params, *, compute_dtype=jnp.float32, bm=None):
    """params: list of (W, b), W in torch layout (d_out, d_in), b (d_out, 1).
    Returns (N, d_out_last).  compute_dtype=bfloat16 runs MXU matmuls and the
    tanh chain in bf16 (f32 accumulation) — use on v6e/v7x when accuracy allows."""
    N, d_in = x.shape
    num_layers = len(params)
    d_out = params[-1][0].shape[0]
    compute_dtype = jnp.dtype(compute_dtype)

    if bm is None:
        bm = _choose_bm(N)
    assert bm % _LANES == 0, "bm must be a multiple of 128 (lane-dense tiles)"
    chunk = _CHUNK if (bm % _CHUNK == 0 and bm > _CHUNK) else bm
    num_chunks = bm // chunk
    grid = pl.cdiv(N, bm)

    precision = (lax.Precision.HIGHEST if compute_dtype == jnp.dtype(jnp.float32)
                 else lax.Precision.DEFAULT)

    # Batch on lanes: x^T is (d_in, N).  d_in is tiny so this transpose is a
    # negligible HBM pass; the output store stays lane-dense.  No jnp.pad —
    # the ragged last block is padded/masked by Pallas (per-lane computation,
    # padded lanes never reach real outputs).
    xt = x.T

    modes = []
    flat_params = []
    in_specs = [pl.BlockSpec((d_in, bm), lambda i: (0, i))]
    for (w, b) in params:
        mode = _layer_mode(w.shape[0], w.shape[1])
        modes.append(mode)
        if mode == "mxu":
            w_in = w.astype(compute_dtype)       # cast once, not per grid step
        elif mode == "reduce":
            w_in = w.T.astype(jnp.float32)       # (d_in, 1): mul + sublane reduce
        else:
            w_in = w.astype(jnp.float32)
        flat_params += [w_in, b.astype(jnp.float32)]
        # Whole-array, VMEM-resident for the entire grid (params are a few KiB).
        in_specs.append(pl.BlockSpec(memory_space=pltpu.MemorySpace.VMEM))
        in_specs.append(pl.BlockSpec(memory_space=pltpu.MemorySpace.VMEM))
    # TODO(synk): for much deeper MLPs, pack all weights/biases into a single
    # padded VMEM-resident array to cut per-param DMA descriptor setup.

    out_spec = pl.BlockSpec((d_out, bm), lambda i: (0, i))

    out_t = pl.pallas_call(
        make_mlp_kernel(tuple(modes), chunk=chunk, num_chunks=num_chunks,
                        compute_dtype=compute_dtype, precision=precision),
        out_shape=jax.ShapeDtypeStruct((d_out, N), x.dtype),
        grid=(grid,),
        in_specs=in_specs,
        out_specs=out_spec,
        compiler_params=pltpu.CompilerParams(
            dimension_semantics=("parallel",)),
    )(xt, *flat_params)

    return out_t.T


def init_params(layers, key):
    """Deterministic init mimicking torch.nn.Linear default:
    U(-1/sqrt(fan_in), 1/sqrt(fan_in)) for weight and bias.
    Weights in torch layout (fan_out, fan_in), bias as (fan_out, 1)."""
    params = []
    for i in range(len(layers) - 1):
        fan_in, fan_out = layers[i], layers[i + 1]
        key, kw, kb = jax.random.split(key, 3)
        bound = 1.0 / jnp.sqrt(jnp.float32(fan_in))
        w = jax.random.uniform(kw, (fan_out, fan_in), jnp.float32, -bound, bound)
        b = jax.random.uniform(kb, (fan_out, 1), jnp.float32, -bound, bound)
        params.append((w, b))
    return params


def dnn_reference(x, params):
    h = x
    for i, (w, b) in enumerate(params):
        h = jnp.dot(h, w.T, precision=lax.Precision.HIGHEST) + b[:, 0]
        if i < len(params) - 1:
            h = jnp.tanh(h)
    return h


if __name__ == "__main__":
    # DNN(layers=[2, 32, 32, 1]) — typical PINN-style MLP from the module.
    layers = [2, 32, 32, 1]
    key = jax.random.PRNGKey(0)
    key, kx = jax.random.split(key)
    params = init_params(layers, key)

    # 1) Small batch: single 128-lane block, single chunk, ragged lanes.
    N = 64
    x = jax.random.normal(kx, (N, layers[0]), jnp.float32)
    out = jax.block_until_ready(dnn_forward(x, params))
    ref = dnn_reference(x, params)
    assert out.shape == (N, layers[-1])
    assert jnp.allclose(out, ref, atol=1e-5, rtol=1e-5)

    # 2) Larger ragged batch: exercises the even "parallel" grid split
    #    (2 blocks for v7x's 2 TCs), the in-kernel 512-lane chunk loop and the
    #    masked edge block (no wrapper-side padding).
    key, kx2 = jax.random.split(key)
    N2 = 2500
    x2 = jax.random.normal(kx2, (N2, layers[0]), jnp.float32)
    out2 = jax.block_until_ready(dnn_forward(x2, params))
    ref2 = dnn_reference(x2, params)
    assert out2.shape == (N2, layers[-1])
    assert jnp.allclose(out2, ref2, atol=1e-5, rtol=1e-5)

    # 3) bf16 compute path (bf16 MXU inputs + bf16 tanh on the EUP for
    #    v6e/v7x); accuracy/speed tradeoff the caller opts into → loose tol.
    out3 = jax.block_until_ready(
        dnn_forward(x2, params, compute_dtype=jnp.bfloat16))
    assert out3.shape == (N2, layers[-1])
    assert jnp.allclose(out3, ref2, atol=5e-2, rtol=5e-2)

    print("KERNEL_OK")
</pallas_src>

<mosaic_0001>
module attributes {stable_mosaic.version = 11 : i64} {
  func.func @kernel(%arg0: i32, %arg1: memref<2x128xf32, #tpu.memory_space<vmem>>, %arg2: memref<32x2xf32, #tpu.memory_space<vmem>>, %arg3: memref<32x1xf32, #tpu.memory_space<vmem>>, %arg4: memref<32x32xf32, #tpu.memory_space<vmem>>, %arg5: memref<32x1xf32, #tpu.memory_space<vmem>>, %arg6: memref<32x1xf32, #tpu.memory_space<vmem>>, %arg7: memref<1x1xf32, #tpu.memory_space<vmem>>, %arg8: memref<1x128xf32, #tpu.memory_space<vmem>>) attributes {dimension_semantics = [#tpu.dimension_semantics<parallel>], iteration_bounds = array<i64: 1>, scalar_prefetch = 0 : i64, scratch_operands = 0 : i64, tpu.core_type = #tpu.core_type<tc>, window_params = [{transform_indices = @transform_0, window_bounds = array<i64: 2, 128>}, {pipeline_mode = #tpu.pipeline_mode<synchronous>, transform_indices = @transform_1, window_bounds = array<i64: 32, 2>}, {pipeline_mode = #tpu.pipeline_mode<synchronous>, transform_indices = @transform_2, window_bounds = array<i64: 32, 1>}, {pipeline_mode = #tpu.pipeline_mode<synchronous>, transform_indices = @transform_3, window_bounds = array<i64: 32, 32>}, {pipeline_mode = #tpu.pipeline_mode<synchronous>, transform_indices = @transform_4, window_bounds = array<i64: 32, 1>}, {pipeline_mode = #tpu.pipeline_mode<synchronous>, transform_indices = @transform_5, window_bounds = array<i64: 32, 1>}, {pipeline_mode = #tpu.pipeline_mode<synchronous>, transform_indices = @transform_6, window_bounds = array<i64: 1, 1>}, {transform_indices = @transform_7, window_bounds = array<i64: 1, 128>}]} {
    %c0 = arith.constant 0 : index
    %c0_0 = arith.constant 0 : index
    %0 = vector.load %arg2[%c0, %c0_0] : memref<32x2xf32, #tpu.memory_space<vmem>>, vector<32x2xf32>
    %c0_1 = arith.constant 0 : index
    %c0_2 = arith.constant 0 : index
    %1 = vector.load %arg4[%c0_1, %c0_2] : memref<32x32xf32, #tpu.memory_space<vmem>>, vector<32x32xf32>
    %c0_3 = arith.constant 0 : index
    %c0_4 = arith.constant 0 : index
    %2 = vector.load %arg6[%c0_3, %c0_4] : memref<32x1xf32, #tpu.memory_space<vmem>>, vector<32x1xf32>
    %c0_5 = arith.constant 0 : index
    %c0_6 = arith.constant 0 : index
    %3 = vector.load %arg3[%c0_5, %c0_6] : memref<32x1xf32, #tpu.memory_space<vmem>>, vector<32x1xf32>
    %c0_7 = arith.constant 0 : index
    %c0_8 = arith.constant 0 : index
    %4 = vector.load %arg5[%c0_7, %c0_8] : memref<32x1xf32, #tpu.memory_space<vmem>>, vector<32x1xf32>
    %c0_9 = arith.constant 0 : index
    %c0_10 = arith.constant 0 : index
    %5 = vector.load %arg7[%c0_9, %c0_10] : memref<1x1xf32, #tpu.memory_space<vmem>>, vector<1x1xf32>
    %c0_i32 = arith.constant 0 : i32
    %c128_i32 = arith.constant 128 : i32
    %6 = arith.muli %c0_i32, %c128_i32 : i32
    %7 = tpu.assume_multiple %6, 128 : i32
    %c0_11 = arith.constant 0 : index
    %8 = arith.index_cast %7 : i32 to index
    %9 = vector.load %arg1[%c0_11, %8] : memref<2x128xf32, #tpu.memory_space<vmem>>, vector<2x128xf32>
    %10 = vector.extract_strided_slice %0 {offsets = [0, 0], sizes = [32, 1], strides = [1, 1]} : vector<32x2xf32> to vector<32x1xf32>
    %11 = vector.extract_strided_slice %9 {offsets = [0, 0], sizes = [1, 128], strides = [1, 1]} : vector<2x128xf32> to vector<1x128xf32>
    %12 = vector.broadcast %10 : vector<32x1xf32> to vector<32x128xf32>
    %13 = vector.broadcast %11 : vector<1x128xf32> to vector<32x128xf32>
    %14 = arith.mulf %12, %13 : vector<32x128xf32>
    %15 = vector.broadcast %3 : vector<32x1xf32> to vector<32x128xf32>
    %16 = arith.addf %15, %14 : vector<32x128xf32>
    %17 = vector.extract_strided_slice %0 {offsets = [0, 1], sizes = [32, 1], strides = [1, 1]} : vector<32x2xf32> to vector<32x1xf32>
    %18 = vector.extract_strided_slice %9 {offsets = [1, 0], sizes = [1, 128], strides = [1, 1]} : vector<2x128xf32> to vector<1x128xf32>
    %19 = vector.broadcast %17 : vector<32x1xf32> to vector<32x128xf32>
    %20 = vector.broadcast %18 : vector<1x128xf32> to vector<32x128xf32>
    %21 = arith.mulf %19, %20 : vector<32x128xf32>
    %22 = arith.addf %16, %21 : vector<32x128xf32>
    %23 = math.tanh %22 : vector<32x128xf32>
    %cst = arith.constant dense<0.000000e+00> : vector<32x128xf32>
    %24 = tpu.matmul %1, %23, %cst {dimension_numbers = #tpu.dot_dimension_numbers<[1], [0], [0], [1], [0, 0, 1, 1], [], []>, precision = #tpu.contract_precision<fp32>} : vector<32x32xf32>, vector<32x128xf32>, vector<32x128xf32> -> vector<32x128xf32>
    %25 = vector.broadcast %4 : vector<32x1xf32> to vector<32x128xf32>
    %26 = arith.addf %24, %25 : vector<32x128xf32>
    %27 = math.tanh %26 : vector<32x128xf32>
    %28 = vector.broadcast %2 : vector<32x1xf32> to vector<32x128xf32>
    %29 = arith.mulf %28, %27 : vector<32x128xf32>
    %cst_12 = arith.constant dense<0.000000e+00> : vector<128xf32>
    %30 = vector.multi_reduction <add>, %29, %cst_12 [0] : vector<32x128xf32> to vector<128xf32>
    %31 = vector.shape_cast %30 : vector<128xf32> to vector<1x128xf32>
    %32 = vector.broadcast %5 : vector<1x1xf32> to vector<1x128xf32>
    %33 = arith.addf %31, %32 : vector<1x128xf32>
    %c0_13 = arith.constant 0 : index
    %34 = arith.index_cast %7 : i32 to index
    %35 = vector.load %arg8[%c0_13, %34] : memref<1x128xf32, #tpu.memory_space<vmem>>, vector<1x128xf32>
    tpu.vector_store %arg8[%c0_13, %34], %33 {strides = array<i32>} : memref<1x128xf32, #tpu.memory_space<vmem>>, vector<1x128xf32>,
    %c1_i32 = arith.constant 1 : i32
    return
  }
  func.func @transform_0(%arg0: i32) -> (i32, i32) {
    %c0_i32 = arith.constant 0 : i32
    %c0_i32_0 = arith.constant 0 : i32
    return %c0_i32, %arg0 : i32, i32
  }
  func.func @transform_1(%arg0: i32) -> (i32, i32) {
    %c0_i32 = arith.constant 0 : i32
    %c0_i32_0 = arith.constant 0 : i32
    %c0_i32_1 = arith.constant 0 : i32
    return %c0_i32, %c0_i32_0 : i32, i32
  }
  func.func @transform_2(%arg0: i32) -> (i32, i32) {
    %c0_i32 = arith.constant 0 : i32
    %c0_i32_0 = arith.constant 0 : i32
    %c0_i32_1 = arith.constant 0 : i32
    return %c0_i32, %c0_i32_0 : i32, i32
  }
  func.func @transform_3(%arg0: i32) -> (i32, i32) {
    %c0_i32 = arith.constant 0 : i32
    %c0_i32_0 = arith.constant 0 : i32
    %c0_i32_1 = arith.constant 0 : i32
    return %c0_i32, %c0_i32_0 : i32, i32
  }
  func.func @transform_4(%arg0: i32) -> (i32, i32) {
    %c0_i32 = arith.constant 0 : i32
    %c0_i32_0 = arith.constant 0 : i32
    %c0_i32_1 = arith.constant 0 : i32
    return %c0_i32, %c0_i32_0 : i32, i32
  }
  func.func @transform_5(%arg0: i32) -> (i32, i32) {
    %c0_i32 = arith.constant 0 : i32
    %c0_i32_0 = arith.constant 0 : i32
    %c0_i32_1 = arith.constant 0 : i32
    return %c0_i32, %c0_i32_0 : i32, i32
  }
  func.func @transform_6(%arg0: i32) -> (i32, i32) {
    %c0_i32 = arith.constant 0 : i32
    %c0_i32_0 = arith.constant 0 : i32
    %c0_i32_1 = arith.constant 0 : i32
    return %c0_i32, %c0_i32_0 : i32, i32
  }
  func.func @transform_7(%arg0: i32) -> (i32, i32) {
    %c0_i32 = arith.constant 0 : i32
    %c0_i32_0 = arith.constant 0 : i32
    return %c0_i32, %arg0 : i32, i32
  }
}

</mosaic_0001>

<bundles_post_ra>
// kernel: tpu_custom_call.1
= control target key start
LH: loop header
LB: loop body
LE: loop exit
PB: predicated region body
PF: predicated region fallthrough
CT: control target
= control target key end

     0   :  { %s1284_s0 = inlined_call_operand.vmem [shape: f32[2,64], index: 0, kind: input, shape index: {}]   ;;  %s1285_s1 = inlined_call_operand.vmem [shape: f32[32,2], index: 1, kind: input, shape index: {}]   ;;  %s1286_s2 = inlined_call_operand.vmem [shape: f32[32,1], index: 2, kind: input, shape index: {}]   ;;  %s1287_s3 = inlined_call_operand.vmem [shape: f32[32,32], index: 3, kind: input, shape index: {}]   ;;  %s1288_s4 = inlined_call_operand.vmem [shape: f32[32,1], index: 4, kind: input, shape index: {}]   ;;  %s1289_s5 = inlined_call_operand.vmem [shape: f32[32,1], index: 5, kind: input, shape index: {}]   ;;  %s1290_s6 = inlined_call_operand.<no memory space> [shape: f32[1,1], index: 6, kind: input, shape index: {}]   ;;  %s1291_s7 = inlined_call_operand.hbm [shape: f32[1,64], index: 7, kind: output, shape index: {}]  }
   0x1   :  { %v12_v0 = vstv %s1290_s6 }
   0x2   :  { %13 = vst [vmem:[#allocation2] sm:$0x1] %v12_v0 }
   0x3   :  { %v41_v1 = vld [vmem:[%s1286_s2] sm:$0xff]  ;;  %v1099_v3 = vmov 0   ;;  %v42_v4 = vld [vmem:[%s1286_s2 + $0x8] sm:$0xff] }
   0x4   :  { %v29_v2 = vld [vmem:[%s1285_s1] sm:$0xff]  ;;  %1052 = vset.pattern.permute.xlu1 %v1099_v3  ;;  %1051 = vset.pattern.permute.xlu0 %v1099_v3  ;;  %v30_v5 = vld [vmem:[%s1285_s1 + $0x8] sm:$0xff] }
   0x5   :  { %81 = vperm.xlu1 %1052, %v41_v1   ;;  %53 = vperm.xlu0 %1051, %v29_v2  }
   0x6   :  { %14 = vsyncpa [#allocation4], 0  ;;  %v32_v6 = vld [vmem:[%s1285_s1 + $0x18] sm:$0xff]  ;;  %v1100_v7 = vmov 1   ;;  %v31_v8 = vld [vmem:[%s1285_s1 + $0x10] sm:$0xff]  ;;  %vm155_vm0 = vcmask 261120   ;;  %v71_v27 = vlaneseq }
   0x7   :  { %v43_v9 = vld [vmem:[%s1286_s2 + $0x10] sm:$0xff]  ;;  %v44_v10 = vld [vmem:[%s1286_s2 + $0x18] sm:$0xff]  ;;  %v33_v11 = vld [vmem:[%s1287_s3] sm:$0xff] }
   0x8   :  { %v157_v12 = vsel %vm155_vm0, %v33_v11, 0  ;;  %v45_v18 = vld [vmem:[%s1288_s4] sm:$0xff]  ;;  %v46_v19 = vld [vmem:[%s1288_s4 + $0x8] sm:$0xff]  ;;  %v47_v20 = vld [vmem:[%s1288_s4 + $0x10] sm:$0xff]  ;;  %v1204_v28 = vshrl.u32 %v71_v27, 7 }
   0x9   :  { %86 = vperm.xlu1 %1052, %v42_v4   ;;  %58 = vperm.xlu0 %1051, %v30_v5   ;;  %v1173_v13 = vand.u32 4294901760, %v157_v12  ;;  %v37_v21 = vld [vmem:[%s1289_s5] sm:$0xff]  ;;  %v48_v22 = vld [vmem:[%s1288_s4 + $0x18] sm:$0xff]  ;;  %v39_v23 = vld [vmem:[%s1289_s5 + $0x10] sm:$0xff] }
   0xa   :  { %v38_v24 = vld [vmem:[%s1289_s5 + $0x8] sm:$0xff]  ;;  %v49_v25 = vld [vmem:[#allocation2] sm:$0x1]  ;;  %v40_v26 = vld [vmem:[%s1289_s5 + $0x18] sm:$0xff]  ;;  %v73_v30 = vsub.s32 0, %v1204_v28  ;;  %v121_v33 = vsub.s32 1, %v1204_v28 }
   0xb   :  { %v1176_v14 = vsub.f32 %v157_v12, %v1173_v13  ;;  %v50_v32 = vld [vmem:[%s1284_s0] sm:$0x3]  ;;  %v34_v57 = vld [vmem:[%s1287_s3 + $0x8] sm:$0xff]  ;;  %v35_v62 = vld [vmem:[%s1287_s3 + $0x10] sm:$0xff] }
   0xc   :  { %v74_v34 = vrot.slane %v50_v32, %v73_v30  ;;  %v122_v38 = vrot.slane %v50_v32, %v121_v33  ;;  %v160_v61 = vsel %vm155_vm0, %v34_v57, 0 }
   0xd   :  { %1053 = vset.pattern.permute.xlu1 %v1100_v7  ;;  %68 = vperm.xlu0 %1051, %v32_v6   ;;  %v239_v15 = vand.u32 4294901760, %v1176_v14 }
   0xe   :  { %108 = vperm.xlu1 %1053, %v30_v5  }
   0xf   :  { %v240_v16 = vsub.f32 %v1176_v14, %v239_v15  ;;  %942 = vmatprep.mubr.f32.mxu0 %v239_v15 }
  0x11   :  { %1055 = vset.pattern.permute.xlu0 %v1100_v7  ;;  %v241_v17 = vand.u32 4294901760, %v240_v16 }
  0x12   :  { %1054 = vset.pattern.permute.xlu1 %v1099_v3  ;;  %104 = vperm.xlu0 %1055, %v29_v2   ;;  %v36_v2 = vld [vmem:[%s1287_s3 + $0x18] sm:$0xff]  ;;  %s1101_s3 = smov [#allocation3]  }
  0x13   :  { %63 = vperm.xlu1 %1054, %v31_v8   ;;  %900 = vmatprep.mubr.f32.mxu1 %v241_v17  ;;  %s836_s15 = sshll.u32 %s1101_s3, 4  ;;  %s837_s15 = int_to_ptr.vmem [resolvable:$true] %s836_s15 }
  0x14   :  { %s1075_s16 = scalar_lea.vmem %s837_s15, 16  ;;  %s1079_s17 = scalar_lea.vmem %s837_s15, 32 }
  0x15   :  { %p1076_p0 = scmp.ne.s32.totalorder %s837_s15, %s1075_s16  ;;  %p1080_p1 = scmp.lt.s32.totalorder %s837_s15, %s837_s15 }
  0x16   :  { %112 = vperm.xlu0 %1055, %v31_v8   ;;  %p1081_p2 = scmp.lt.s32.totalorder %s1079_s17, %s1075_s16 }
  0x17   :  { %91 = vperm.xlu1 %1054, %v43_v9  }
  0x18   :  { %p1082_p3 = por %p1081_p2, %p1080_p1 }
  0x1a   :  { %1058 = vset.pattern.permute.xlu0 %v1099_v3  ;;  %p1083_p4 = pnand %p1082_p3, %p1076_p0 }
  0x1b   :  { %96 = vperm.xlu1 %1054, %v44_v10   ;;  %142 = vperm.xlu0 %1058, %v46_v19   ;;  %v166_v10 = vsel %vm155_vm0, %v36_v2, 0 }
  0x1c   :  { %v1238_v17 = vand.u32 4294901760, %v166_v10 }
  0x1f   :  { %1056 = vset.pattern.permute.xlu1 %v1100_v7  ;;  %788 = vperm.xlu0 %1058, %v37_v21   ;;  %v163_v7 = vsel %vm155_vm0, %v35_v62, 0 }
  0x20   :  { %116 = vperm.xlu1 %1056, %v32_v6   ;;  %v1223_v6 = vand.u32 4294901760, %v160_v61  ;;  %v1231_v15 = vand.u32 4294901760, %v163_v7 }
  0x22   :  { %v1236_v16 = vsub.f32 %v160_v61, %v1223_v6  ;;  %v1241_v21 = vsub.f32 %v163_v7, %v1231_v15 }
  0x23   :  { %798 = vperm.xlu0 %1058, %v39_v23   ;;  %v1245_v23 = vsub.f32 %v166_v10, %v1238_v17 }
  0x24   :  { %1057 = vset.pattern.permute.xlu1 %v1099_v3  ;;  %v259_v27 = vand.u32 4294901760, %v1241_v21 }
  0x25   :  { %137 = vperm.xlu1 %1057, %v45_v18   ;;  %v269_v32 = vand.u32 4294901760, %v1245_v23 }
  0x27   :  { %821 = vperm.xlu0 %1058, %v49_v25  }
  0x29   :  { %147 = vperm.xlu1 %1057, %v47_v20  }
  0x2d   :  { %152 = vperm.xlu1 %1057, %v48_v22   ;;  %v249_v22 = vand.u32 4294901760, %v1236_v16 }
  0x31   :  { %793 = vperm.xlu1 %1057, %v38_v24  }
  0x35   :  { %803 = vperm.xlu1 %1057, %v40_v26  }
  0x84   :  { %v82_v29 = vpop.permute.xlu1 %81  ;;  %v54_v31 = vpop.permute.xlu0 %53 }
  0x85   :  { %v75_v41 = vmul.f32 %v74_v34, %v54_v31  ;;  %v250_v31 = vsub.f32 %v1236_v16, %v249_v22 }
  0x87   :  { %v99_v46 = vadd.f32 %v82_v29, %v75_v41  ;;  %v270_v41 = vsub.f32 %v1245_v23, %v269_v32 }
  0x88   :  { %v87_v35 = vpop.permute.xlu1 %86  ;;  %v59_v36 = vpop.permute.xlu0 %58 }
  0x89   :  { %v76_v37 = vmul.f32 %v74_v34, %v59_v36 }
  0x8b   :  { %v100_v42 = vadd.f32 %v87_v35, %v76_v37 }
  0x8c   :  { %v69_v39 = vpop.permute.xlu0 %68 }
  0x8d   :  { %v109_v40 = vpop.permute.xlu1 %108  ;;  %v78_v59 = vmul.f32 %v74_v34, %v69_v39  ;;  %v260_v39 = vsub.f32 %v1241_v21, %v259_v27 }
  0x8e   :  { %v124_v43 = vmul.f32 %v122_v38, %v109_v40  ;;  %v251_v40 = vand.u32 4294901760, %v250_v31 }
  0x90   :  { %v128_v44 = vadd.f32 %v124_v43, %v100_v42 }
  0x91   :  { %v105_v45 = vpop.permute.xlu0 %104 }
  0x92   :  { %v123_v47 = vmul.f32 %v122_v38, %v105_v45  ;;  %v64_v48 = vpop.permute.xlu1 %63  ;;  %1059 = vtanh.f32 %v128_v44 }
  0x93   :  { %v77_v50 = vmul.f32 %v74_v34, %v64_v48 }
  0x94   :  { %v127_v49 = vadd.f32 %v123_v47, %v99_v46  ;;  %v261_v46 = vand.u32 4294901760, %v260_v39 }
  0x95   :  { %v113_v51 = vpop.permute.xlu0 %112 }
  0x96   :  { %1061 = vtanh.f32 %v127_v49  ;;  %v92_v52 = vpop.permute.xlu1 %91  ;;  %v125_v53 = vmul.f32 %v122_v38, %v113_v51  ;;  %v271_v49 = vand.u32 4294901760, %v270_v41 }
  0x97   :  { %v101_v54 = vadd.f32 %v92_v52, %v77_v50 }
  0x99   :  { %v129_v55 = vadd.f32 %v125_v53, %v101_v54 }
  0x9a   :  { %v97_v56 = vpop.permute.xlu1 %96  ;;  %v143_v57 = vpop.permute.xlu0 %142 }
  0x9b   :  { %1063 = vtanh.f32 %v129_v55  ;;  %v102_v0 = vadd.f32 %v97_v56, %v78_v59 }
  0x9c   :  { %v1060_v58 = vpop.eup %1059 }
  0x9d   :  { %v172_v3 = vand.u32 4294901760, %v1060_v58 }
  0x9f   :  { %v117_v60 = vpop.permute.xlu1 %116  ;;  %v286_v12 = vsub.f32 %v1060_v58, %v172_v3 }
  0xa0   :  { %v1062_v63 = vpop.eup %1061  ;;  %v126_v1 = vmul.f32 %v122_v38, %v117_v60 }
  0xa1   :  { %v169_v4 = vand.u32 4294901760, %v1062_v63  ;;  %v287_v20 = vand.u32 4294901760, %v286_v12 }
  0xa2   :  { %v130_v5 = vadd.f32 %v126_v1, %v102_v0 }
  0xa3   :  { %v1226_v8 = vpack.c.bf16 %v172_v3, %v169_v4  ;;  %v279_v9 = vsub.f32 %v1062_v63, %v169_v4  ;;  %v288_v26 = vsub.f32 %v286_v12, %v287_v20 }
  0xa4   :  { %1065 = vtanh.f32 %v130_v5  ;;  %v138_v55 = vpop.permute.xlu1 %137 }
  0xa5   :  { %v1064_v11 = vpop.eup %1063  ;;  %977 = vmatprep.subr.bf16.mxu1 %v1226_v8  ;;  %1001 = vmatprep.subr.bf16.mxu0 %v1226_v8  ;;  %v280_v19 = vand.u32 4294901760, %v279_v9  ;;  %v289_v37 = vand.u32 4294901760, %v288_v26  ;;  %v992_v53 = vpack.c.bf16 %v286_v12, %v279_v9 }
  0xa6   :  { %979 = vmatpush3.bf16.msra.mxu1 %v1226_v8  ;;  %1003 = vmatpush3.bf16.msra.mxu0 %v1226_v8  ;;  %v175_v18 = vand.u32 4294901760, %v1064_v11 }
  0xa7   :  { %v281_v24 = vsub.f32 %v279_v9, %v280_v19  ;;  %v1008_v43 = vpack.c.bf16 %v287_v20, %v280_v19  ;;  %v789_v9 = vpop.permute.xlu0 %788 }
  0xa8   :  { %v293_v25 = vsub.f32 %v1064_v11, %v175_v18  ;;  %v148_v56 = vpop.permute.xlu1 %147 }
  0xa9   :  { %v282_v34 = vand.u32 4294901760, %v281_v24 }
  0xaa   :  { %v294_v35 = vand.u32 4294901760, %v293_v25 }
  0xab   :  { %v984_v42 = vpack.c.bf16 %v289_v37, %v282_v34  ;;  %v799_v20 = vpop.permute.xlu0 %798 }
  0xac   :  { %v295_v45 = vsub.f32 %v293_v25, %v294_v35  ;;  %v153_v63 = vpop.permute.xlu1 %152 }
  0xae   :  { %v1066_v29 = vpop.eup %1065  ;;  %v296_v50 = vand.u32 4294901760, %v295_v45 }
  0xaf   :  { %v178_v33 = vand.u32 4294901760, %v1066_v29 }
  0xb0   :  { %v794_v11 = vpop.permute.xlu1 %793 }
  0xb1   :  { %v980_v36 = vpack.c.bf16 %v178_v33, %v175_v18  ;;  %v300_v38 = vsub.f32 %v1066_v29, %v178_v33 }
  0xb3   :  { %981 = vmatprep.subr.bf16.mxu1 %v980_v36  ;;  %1005 = vmatprep.subr.bf16.mxu0 %v980_v36  ;;  %v301_v44 = vand.u32 4294901760, %v300_v38  ;;  %v996_v54 = vpack.c.bf16 %v300_v38, %v293_v25 }
  0xb4   :  { %983 = vmatpush3.bf16.msra.mxu1 %v980_v36  ;;  %1007 = vmatpush3.bf16.msra.mxu0 %v980_v36 }
  0xb5   :  { %985 = vmatprep.subr.bf16.mxu1 %v984_v42  ;;  %1009 = vmatprep.subr.bf16.mxu0 %v1008_v43  ;;  %v302_v47 = vsub.f32 %v300_v38, %v301_v44  ;;  %v1012_v48 = vpack.c.bf16 %v301_v44, %v294_v35 }
  0xb7   :  { %901 = vmatmul.mubr.f32.vlgmr.msra.gmra.mrb[0].mxu1 %v251_v40  ;;  %943 = vmatmul.mubr.f32.vlgmr.msra.gmra.mrb[0].mxu0 %v249_v22  ;;  %v303_v51 = vand.u32 4294901760, %v302_v47  ;;  %v804_v22 = vpop.permute.xlu1 %803 }
  0xb8   :  { %987 = vmatpush3.bf16.msra.mxu1 %v984_v42  ;;  %1011 = vmatpush3.bf16.msra.mxu0 %v1008_v43 }
  0xb9   :  { %1013 = vmatprep.subr.bf16.mxu0 %v1012_v48  ;;  %903 = vmatprep.mubr.f32.mxu1 %v261_v46  ;;  %v988_v52 = vpack.c.bf16 %v303_v51, %v296_v50 }
  0xba   :  { %945 = vmatprep.mubr.f32.mxu0 %v259_v27 }
  0xbb   :  { %904 = vmatmul.mubr.f32.gmra.mrb[2].mxu1 %v271_v49  ;;  %989 = vmatprep.subr.bf16.mxu1 %v988_v52 }
  0xbc   :  { %946 = vmatmul.mubr.f32.gmra.mrb[2].mxu0 %v269_v32  ;;  %991 = vmatpush3.bf16.msra.mxu1 %v988_v52  ;;  %v822_v32 = vpop.permute.xlu0 %821 }
  0xbd   :  { %1015 = vmatpush3.bf16.msra.mxu0 %v1012_v48  ;;  %993 = vmatprep.subr.bf16.mxu1 %v992_v53  ;;  %v827_v34 = vrot.slane %v822_v32, %v73_v30 }
  0xbe   :  { %1017 = vmatprep.subr.bf16.mxu0 %v1226_v8  ;;  %914 = vmatprep.mubr.f32.mxu1 %v1173_v13 }
  0xbf   :  { %956 = vmatprep.mubr.f32.mxu0 %v1173_v13  ;;  %915 = vmatmul.mubr.f32.vlgmr.msra.gmra.mrb[0].mxu1 %v1223_v6 }
  0xc0   :  { %957 = vmatmul.mubr.f32.vlgmr.msra.gmra.mrb[0].mxu0 %v1223_v6  ;;  %995 = vmatpush3.bf16.msra.mxu1 %v992_v53 }
  0xc1   :  { %1019 = vmatpush3.bf16.msra.mxu0 %v1226_v8  ;;  %997 = vmatprep.subr.bf16.mxu1 %v996_v54 }
  0xc2   :  { %1021 = vmatprep.subr.bf16.mxu0 %v980_v36  ;;  %917 = vmatprep.mubr.f32.mxu1 %v1231_v15 }
  0xc3   :  { %959 = vmatprep.mubr.f32.mxu0 %v1231_v15  ;;  %918 = vmatmul.mubr.f32.gmra.mrb[2].mxu1 %v1238_v17 }
  0xc4   :  { %960 = vmatmul.mubr.f32.gmra.mrb[2].mxu0 %v1238_v17  ;;  %999 = vmatpush3.bf16.msra.mxu1 %v996_v54 }
  0xc5   :  { %1023 = vmatpush3.bf16.msra.mxu0 %v980_v36  ;;  %928 = vmatprep.mubr.f32.mxu1 %v1176_v14 }
  0xc6   :  { %970 = vmatprep.mubr.f32.mxu0 %v1173_v13 }
  0xc7   :  { %929 = vmatmul.mubr.f32.vlgmr.msra.gmra.mrb[0].mxu1 %v1236_v16 }
  0xc8   :  { %971 = vmatmul.mubr.f32.vlgmr.msra.gmra.mrb[0].mxu0 %v1223_v6  ;;  %931 = vmatprep.mubr.f32.mxu1 %v1241_v21 }
  0xc9   :  { %973 = vmatprep.mubr.f32.mxu0 %v1231_v15 }
  0xcb   :  { %932 = vmatmul.mubr.f32.gmra.mrb[2].mxu1 %v1245_v23 }
  0xcc   :  { %974 = vmatmul.mubr.f32.gmra.mrb[2].mxu0 %v1238_v17 }
 0x19a   :  { %v930_v58 = vpop.f32.mrb[0].mxu1 }
 0x19b   :  { %v1024_v59 = vadd.f32 %v930_v58, %v143_v57  ;;  %v972_v14 = vpop.f32.mrb[0].mxu0  ;;  %v462_v60 = vpop.f32.mrb[1].mxu1 }
 0x19c   :  { %v1026_v13 = vadd.f32 %v462_v60, %v138_v55  ;;  %v760_v61 = vpop.f32.mrb[1].mxu0 }
 0x19d   :  { %v1025_v62 = vadd.f32 %v1024_v59, %v972_v14 }
 0x19e   :  { %v1027_v0 = vadd.f32 %v1026_v13, %v760_v61  ;;  %v933_v1 = vpop.f32.mrb[2].mxu1 }
 0x19f   :  { %1067 = vtanh.f32 %v1025_v62  ;;  %v1028_v2 = vadd.f32 %v933_v1, %v153_v63  ;;  %v975_v3 = vpop.f32.mrb[2].mxu0  ;;  %v476_v4 = vpop.f32.mrb[3].mxu1 }
 0x1a0   :  { %1069 = vtanh.f32 %v1027_v0  ;;  %v1030_v5 = vadd.f32 %v476_v4, %v148_v56  ;;  %v772_v6 = vpop.f32.mrb[3].mxu0 }
 0x1a1   :  { %v1029_v7 = vadd.f32 %v1028_v2, %v975_v3 }
 0x1a2   :  { %v1031_v8 = vadd.f32 %v1030_v5, %v772_v6 }
 0x1a3   :  { %1071 = vtanh.f32 %v1029_v7 }
 0x1a4   :  { %1073 = vtanh.f32 %v1031_v8 }
 0x1a9   :  { %v1068_v10 = vpop.eup %1067 }
 0x1aa   :  { %v1070_v12 = vpop.eup %1069  ;;  %v807_v15 = vmul.f32 %v1068_v10, %v794_v11 }
 0x1ab   :  { %v806_v16 = vmul.f32 %v1070_v12, %v789_v9 }
 0x1ad   :  { %v1072_v17 = vpop.eup %1071  ;;  %v810_v18 = vadd.f32 %v807_v15, %v806_v16 }
 0x1ae   :  { %v1074_v19 = vpop.eup %1073  ;;  %v809_v23 = vmul.f32 %v1072_v17, %v804_v22 }
 0x1af   :  { %v808_v21 = vmul.f32 %v1074_v19, %v799_v20 }
 0x1b1   :  { %v811_v24 = vadd.f32 %v810_v18, %v808_v21 }
 0x1b3   :  { %v812_v25 = vadd.f32 %v811_v24, %v809_v23 }
 0x1b5   :  { %v813_v26 = vrot.slane %v812_v25, 4 }
 0x1b7   :  { %v814_v27 = vadd.f32 %v813_v26, %v812_v25 }
 0x1b9   :  { %v815_v29 = vrot.slane %v814_v27, 2 }
 0x1bb   :  { %v816_v31 = vadd.f32 %v815_v29, %v814_v27 }
 0x1bd   :  { %v817_v33 = vrot.slane %v816_v31, 1 }
 0x1bf   :  { %v818_v35 = vadd.f32 %v817_v33, %v816_v31 }
 0x1c1   :  { %v828_v36 = vadd.f32 %v827_v34, %v818_v35 }
 0x1c3   :  { %829 = vst [vmem:[#allocation3] sm:$0x1] %v828_v36 }
 0x1c4   :  { %1086 = shalt.err (!%p1083_p4)
}
 0x1c5   :  { %s1087_s2 = scalar_lea.hbm %s1291_s7, 16 }
 0x1c6   :  { %p1088_p5 = scmp.ne.s32.totalorder %s1291_s7, %s1087_s2  ;;  %p1091_p6 = scmp.lt.u32.totalorder %s1087_s2, %s1291_s7 }
 0x1c8   :  { %p1093_p7 = pnand %p1091_p6, %p1088_p5 }
 0x1ca   :  { %1096 = shalt.err (!%p1093_p7)
}
 0x1cb   :  { %839 = dma.vmem_to_hbm [thread:$0]  %s837_s15, 16, %s1291_s7, [#allocation4]  }
 0x1cc   :  { %1097 = dma.done.wait [#allocation4], 16  }
 0x1cd   :  { %1098 = vsyncadd [#allocation4], 4294967280 }
 0x1ce   :  { %843 = vsyncpa [#allocation4], 1 }

</bundles_post_ra>
